<compile_context>
chip_gen: v6e
topology: v6e:2x2x1
jax: 0.10.0
libtpu: 0.0.40
codegen_flags: <defaults>
</compile_context>

<pallas_src>
import functools
import math

import jax
import jax.numpy as jnp
from jax import lax
from jax.experimental import pallas as pl
from jax.experimental.pallas import tpu as pltpu

_LANE = 128                            # lane width (output N padding target)
_SUBLANE = 8                           # sublane width (batch tiling granule)
_MAX_TILE_B = 1024                     # batch tile cap (amortizes per-step overhead)
_VMEM_TILE_BUDGET = 24 * 1024 * 1024   # conservative: fits v7x 32 MiB scoped default


def _round_up(n: int, m: int) -> int:
    return ((n + m - 1) // m) * m


def _linear_kernel(x_ref, w_ref, b_ref, o_ref):
    # x_ref: (tile_b, in_dim)   activations, K left unpadded
    # w_ref: (in_dim, n_pad)    pre-transposed weight, N lane-padded (VMEM-resident)
    # b_ref: (1, n_pad)         f32 bias (VMEM-resident)
    # o_ref: (tile_b, n_pad)    lane-dense output tile
    acc = lax.dot_general(
        x_ref[...],
        w_ref[...],
        dimension_numbers=(((1,), (0,)), ((), ())),   # plain NN matmul, no transpose
        preferred_element_type=jnp.float32,
    )
    o_ref[...] = (acc + b_ref[...]).astype(o_ref.dtype)


@functools.partial(jax.jit, static_argnames=("out_dim",))
def linear_readout(x: jax.Array, w_t_pad: jax.Array, b_pad: jax.Array,
                   out_dim: int) -> jax.Array:
    """y = x @ W.T + b with W supplied pre-transposed and N-lane-padded."""
    batch, in_dim = x.shape
    k_dim, n_pad = w_t_pad.shape
    assert in_dim == k_dim, "x feature dim must match the session weight"
    itemsize = jnp.dtype(w_t_pad.dtype).itemsize

    # Make dtype promotion explicit (avoid silent f32 promotion surprises).
    x = x.astype(w_t_pad.dtype)

    # --- batch tiling -----------------------------------------------------
    steps = pl.cdiv(batch, _MAX_TILE_B)
    if batch >= 2 * _SUBLANE:
        steps = max(steps, 2)          # >=2 parallel steps => both v7x TCs get work
    tile_b = _round_up(pl.cdiv(batch, steps), _SUBLANE)

    # Cap the tile so the double-buffered footprint fits a conservative VMEM
    # budget (valid on v5e/v6e 128 MiB and v7x 64 MiB physical / 32 MiB scoped).
    resident_bytes = (in_dim * n_pad + n_pad) * itemsize           # W + bias
    row_bytes = (in_dim + n_pad) * itemsize                        # x row + out row
    max_rows = (_VMEM_TILE_BUDGET - 2 * resident_bytes) // (2 * row_bytes)
    # TODO(synk): a session whose weight alone exceeds the VMEM budget would need
    # a K/N-gridded accumulator variant; not required at these readout sizes.
    tile_cap = max(_SUBLANE, (max_rows // _SUBLANE) * _SUBLANE)
    tile_b = max(_SUBLANE, min(tile_b, tile_cap))

    # Pad batch only up to a tile multiple chosen this way: waste < 8*steps rows
    # (never the old "round batch up to a full 512/1024 tile" blow-up).
    batch_p = _round_up(batch, tile_b)
    if batch_p != batch:
        x_in = jnp.zeros((batch_p, in_dim), dtype=x.dtype).at[:batch].set(x)
    else:
        x_in = x
    grid = (batch_p // tile_b,)

    # --- compiler hints ----------------------------------------------------
    flops = 2 * batch_p * in_dim * n_pad
    bytes_accessed = (x_in.size + w_t_pad.size + b_pad.size
                      + batch_p * n_pad) * itemsize

    vmem_needed = 2 * tile_b * row_bytes + 2 * resident_bytes
    vmem_limit = None
    if vmem_needed > 12 * 1024 * 1024:         # might trip v5e's 16 MiB scoped default
        vmem_limit = min(int(vmem_needed * 1.5) + (2 << 20), 48 * 1024 * 1024)

    y_full = pl.pallas_call(
        _linear_kernel,
        out_shape=jax.ShapeDtypeStruct((batch_p, n_pad), w_t_pad.dtype),
        grid=grid,
        in_specs=[
            pl.BlockSpec((tile_b, in_dim), lambda i: (i, 0),
                         memory_space=pltpu.MemorySpace.VMEM),
            pl.BlockSpec((in_dim, n_pad), lambda i: (0, 0),
                         memory_space=pltpu.MemorySpace.VMEM),
            pl.BlockSpec((1, n_pad), lambda i: (0, 0),
                         memory_space=pltpu.MemorySpace.VMEM),
        ],
        out_specs=pl.BlockSpec((tile_b, n_pad), lambda i: (i, 0),
                               memory_space=pltpu.MemorySpace.VMEM),
        compiler_params=pltpu.CompilerParams(
            dimension_semantics=("parallel",),
            vmem_limit_bytes=vmem_limit),
        cost_estimate=pl.CostEstimate(
            flops=flops, transcendentals=0, bytes_accessed=bytes_accessed),
    )(x_in, w_t_pad, b_pad)

    # Slice back to the logical (batch, out_dim) result.
    return y_full[:batch, :out_dim]


class LinRegModelPallas:
    """Pallas port of LinRegModel: one Linear readout per session."""

    def __init__(self, sessions, in_dim, out_dim, *, seed: int = 0, dtype=jnp.float32):
        self.params = {}          # torch-layout (W (out,in), b (out,)) for reference
        self.compute_params = {}  # pre-transposed, N-lane-padded compute copies
        self.out_dim = dict(out_dim)
        key = jax.random.PRNGKey(seed)
        for session in sessions:
            key, kw, kb = jax.random.split(key, 3)
            fan_in = in_dim[session]
            fan_out = out_dim[session]
            bound = 1.0 / math.sqrt(fan_in)
            # torch.nn.Linear default init: U(-1/sqrt(fan_in), 1/sqrt(fan_in))
            w = jax.random.uniform(
                kw, (fan_out, fan_in), dtype=dtype, minval=-bound, maxval=bound)
            b = jax.random.uniform(
                kb, (fan_out,), dtype=dtype, minval=-bound, maxval=bound)
            self.params[session] = (w, b)

            # Pre-transpose once at init; pad only the output (N) axis to 128
            # so stores are unmasked full-lane vst.  K (in_dim) stays unpadded.
            n_pad = _round_up(fan_out, _LANE)
            w_t_pad = (jnp.zeros((fan_in, n_pad), dtype=dtype)
                       .at[:, :fan_out].set(w.T))
            b_pad = (jnp.zeros((1, n_pad), dtype=jnp.float32)
                     .at[0, :fan_out].set(b.astype(jnp.float32)))
            self.compute_params[session] = (w_t_pad, b_pad)

    def __call__(self, x: jax.Array, session: str) -> jax.Array:
        w_t_pad, b_pad = self.compute_params[session]
        return linear_readout(x, w_t_pad, b_pad, self.out_dim[session])


if __name__ == "__main__":
    sessions = ["sess_a", "sess_b"]
    in_dim = {"sess_a": 32, "sess_b": 16}
    out_dim = {"sess_a": 8, "sess_b": 4}

    model = LinRegModelPallas(sessions, in_dim, out_dim, seed=0)

    key = jax.random.PRNGKey(0)
    ka, kb = jax.random.split(key)
    x_a = jax.random.normal(ka, (2, in_dim["sess_a"]), dtype=jnp.float32)
    x_b = jax.random.normal(kb, (2, in_dim["sess_b"]), dtype=jnp.float32)

    y_a = jax.block_until_ready(model(x_a, "sess_a"))
    y_b = jax.block_until_ready(model(x_b, "sess_b"))

    # Reference check against plain JAX (torch.nn.Linear semantics).
    w_a, b_a = model.params["sess_a"]
    w_b, b_b = model.params["sess_b"]
    ref_a = x_a @ w_a.T + b_a
    ref_b = x_b @ w_b.T + b_b
    assert y_a.shape == (2, out_dim["sess_a"])
    assert y_b.shape == (2, out_dim["sess_b"])
    assert jnp.allclose(y_a, ref_a, atol=1e-5, rtol=1e-5)
    assert jnp.allclose(y_b, ref_b, atol=1e-5, rtol=1e-5)

    print("KERNEL_OK")
</pallas_src>

<mosaic_0001>
module attributes {stable_mosaic.version = 11 : i64} {
  func.func @_linear_kernel(%arg0: i32, %arg1: memref<8x32xf32, #tpu.memory_space<vmem>>, %arg2: memref<32x128xf32, #tpu.memory_space<vmem>>, %arg3: memref<1x128xf32, #tpu.memory_space<vmem>>, %arg4: memref<8x128xf32, #tpu.memory_space<vmem>>) attributes {dimension_semantics = [#tpu.dimension_semantics<parallel>], iteration_bounds = array<i64: 1>, scalar_prefetch = 0 : i64, scratch_operands = 0 : i64, tpu.core_type = #tpu.core_type<tc>, window_params = [{transform_indices = @transform_0, window_bounds = array<i64: 8, 32>}, {pipeline_mode = #tpu.pipeline_mode<synchronous>, transform_indices = @transform_1, window_bounds = array<i64: 32, 128>}, {pipeline_mode = #tpu.pipeline_mode<synchronous>, transform_indices = @transform_2, window_bounds = array<i64: 1, 128>}, {transform_indices = @transform_3, window_bounds = array<i64: 8, 128>}]} {
    %c0 = arith.constant 0 : index
    %c0_0 = arith.constant 0 : index
    %0 = vector.load %arg1[%c0, %c0_0] : memref<8x32xf32, #tpu.memory_space<vmem>>, vector<8x32xf32>
    %c0_1 = arith.constant 0 : index
    %c0_2 = arith.constant 0 : index
    %1 = vector.load %arg2[%c0_1, %c0_2] : memref<32x128xf32, #tpu.memory_space<vmem>>, vector<32x128xf32>
    %cst = arith.constant dense<0.000000e+00> : vector<8x128xf32>
    %2 = tpu.matmul %0, %1, %cst {dimension_numbers = #tpu.dot_dimension_numbers<[1], [0], [0], [1], [0, 0, 1, 1], [], []>} : vector<8x32xf32>, vector<32x128xf32>, vector<8x128xf32> -> vector<8x128xf32>
    %c0_3 = arith.constant 0 : index
    %c0_4 = arith.constant 0 : index
    %3 = vector.load %arg3[%c0_3, %c0_4] : memref<1x128xf32, #tpu.memory_space<vmem>>, vector<1x128xf32>
    %4 = vector.broadcast %3 : vector<1x128xf32> to vector<8x128xf32>
    %5 = arith.addf %2, %4 : vector<8x128xf32>
    %c0_5 = arith.constant 0 : index
    %c0_6 = arith.constant 0 : index
    %6 = vector.load %arg4[%c0_5, %c0_6] : memref<8x128xf32, #tpu.memory_space<vmem>>, vector<8x128xf32>
    tpu.vector_store %arg4[%c0_5, %c0_6], %5 {strides = array<i32>} : memref<8x128xf32, #tpu.memory_space<vmem>>, vector<8x128xf32>,
    return
  }
  func.func @transform_0(%arg0: i32) -> (i32, i32) {
    %c0_i32 = arith.constant 0 : i32
    %c0_i32_0 = arith.constant 0 : i32
    return %arg0, %c0_i32 : i32, i32
  }
  func.func @transform_1(%arg0: i32) -> (i32, i32) {
    %c0_i32 = arith.constant 0 : i32
    %c0_i32_0 = arith.constant 0 : i32
    %c0_i32_1 = arith.constant 0 : i32
    return %c0_i32, %c0_i32_0 : i32, i32
  }
  func.func @transform_2(%arg0: i32) -> (i32, i32) {
    %c0_i32 = arith.constant 0 : i32
    %c0_i32_0 = arith.constant 0 : i32
    %c0_i32_1 = arith.constant 0 : i32
    return %c0_i32, %c0_i32_0 : i32, i32
  }
  func.func @transform_3(%arg0: i32) -> (i32, i32) {
    %c0_i32 = arith.constant 0 : i32
    %c0_i32_0 = arith.constant 0 : i32
    return %arg0, %c0_i32 : i32, i32
  }
}

</mosaic_0001>

<bundles_post_ra>
// kernel: linear_readout.1
= control target key start
LH: loop header
LB: loop body
LE: loop exit
PB: predicated region body
PF: predicated region fallthrough
CT: control target
= control target key end

     0   :  { %8 = vsyncpa [#allocation3], 0  ;;  %s165_s12 = smov [#allocation2]   ;;  %s202_s0 = inlined_call_operand.vmem [shape: f32[8,32], index: 0, kind: input, shape index: {}]   ;;  %s203_s1 = inlined_call_operand.hbm [shape: f32[32,128], index: 1, kind: input, shape index: {}]   ;;  %s204_s2 = inlined_call_operand.vmem [shape: f32[1,128], index: 2, kind: input, shape index: {}]   ;;  %s205_s3 = inlined_call_operand.vmem [shape: f32[8,128], index: 3, kind: output, shape index: {}]  }
   0x1   :  { %s16_s13 = sshll.u32 %s165_s12, 4  ;;  %s17_s13 = int_to_ptr.vmem [resolvable:$true] %s16_s13 }
   0x2   :  { %s151_s14 = scalar_lea.vmem %s17_s13, 512  ;;  %p156_p1 = scmp.lt.s32.totalorder %s17_s13, %s17_s13 }
   0x3   :  { %p152_p0 = scmp.ne.s32.totalorder %s17_s13, %s151_s14  ;;  %p157_p2 = scmp.lt.s32.totalorder %s151_s14, %s151_s14 }
   0x5   :  { %p158_p3 = por %p157_p2, %p156_p1 }
   0x7   :  { %p159_p4 = pnand %p158_p3, %p152_p0 }
   0x9   :  { %162 = shalt.err (!%p159_p4)
}
   0xa   :  { %s166_s15 = smov 128   ;;  %s167_s16 = smov 8  }
   0xb   :  { %22 = dma.hbm_to_vmem [thread:$0]  %s203_s1, 512, %s17_s13, [#allocation3], %s166_s15, %s166_s15, %s167_s16  }
   0xc   :  { %163 = dma.done.wait [#allocation3], 512  }
   0xd   :  { %164 = vsyncadd [#allocation3], 4294966784  ;;  %v168_v0 = vmov 0.0   ;;  %vm169_vm0 = vmmov 0   ;;  %v32_v1 = vld [vmem:[#allocation2 + $0x18] sm:$0xff]  ;;  %v31_v2 = vld [vmem:[#allocation2 + $0x10] sm:$0xff] }
   0xe   :  { %127 = vmatprep.subr.mxu0 %v168_v0  ;;  %135 = vmatprep.mubr.msk.f32.mxu0 %vm169_vm0, %v168_v0  ;;  %v30_v3 = vld [vmem:[#allocation2 + $0x8] sm:$0xff]  ;;  %v29_v4 = vld [vmem:[#allocation2] sm:$0xff]  ;;  %vm40_vm1 = vcmask 261120  }
   0xf   :  { %128 = vmatpush3.msra.mxu0 %v32_v1  ;;  %v28_v5 = vld [vmem:[%s202_s0] sm:$0xff] }
  0x10   :  { %129 = vmatprep.subr.mxu0 %v168_v0  ;;  %v120_v6 = vld [vmem:[%s204_s2] ss:$0 sm:$0xff] }
  0x11   :  { %130 = vmatpush3.msra.mxu0 %v31_v2 }
  0x12   :  { %131 = vmatprep.subr.mxu0 %v168_v0 }
  0x13   :  { %132 = vmatpush3.msra.mxu0 %v30_v3 }
  0x14   :  { %133 = vmatprep.subr.mxu0 %v168_v0 }
  0x15   :  { %134 = vmatpush3.msra.mxu0 %v29_v4 }
  0x16   :  { %136 = vmatmul.mubr.msk.f32.vlgmr.msra.gmra.mxu0 %vm40_vm1, %v28_v5 }
  0xd6   :  { %v110_v7 = vpop.f32.mrf.mxu0 }
  0xd7   :  { %v111_v8 = vadd.f32 %v120_v6, %v110_v7 }
  0xd8   :  { %v137_v9 = vpop.f32.mrf.mxu0 }
  0xd9   :  { %114 = vst [vmem:[%s205_s3] sm:$0xff] %v111_v8 }
  0xda   :  { %119 = vsyncpa [#allocation3], 1 }

</bundles_post_ra>
